<compile_context>
chip_gen: v7x
topology: tpu7x:2x2x1
jax: 0.10.0
libtpu: 0.0.40
codegen_flags: <defaults>
</compile_context>

<pallas_src>
import functools

import jax
import jax.numpy as jnp
from jax.experimental import pallas as pl
from jax.experimental.pallas import tpu as pltpu


def _scale_rows_kernel(x_ref, p_ref, o_ref):
    # x_ref/o_ref: (rows_blk, L) VMEM tile; p_ref: (rows_blk, 1) per-row scale.
    # Lane-broadcast multiply: one VPU op per vreg, stores are unmasked vst.
    o_ref[...] = x_ref[...] * p_ref[...]


def _pick_rows_block(n_rows, n_cols, itemsize, max_tile_bytes=4 * 1024 * 1024):
    """Pick a row-block that is either the full row extent or a multiple of 8,
    keeping each buffer <= ~4 MiB so the double-buffered working set stays far
    below v7x's 64 MiB VMEM (and the 16/32 MiB scoped defaults on v5e/v6e)."""
    row_bytes = max(n_cols * itemsize, 1)
    budget_rows = max(1, max_tile_bytes // row_bytes)
    if budget_rows >= n_rows:
        # Everything fits in one tile. If legal, still split in two so there
        # is a >1-step parallel grid axis for v7x megacore sharding.
        if n_rows >= 16 and (n_rows // 2) % 8 == 0:
            return n_rows // 2
        return n_rows  # full extent -> always a legal block dim
    rows = (budget_rows // 8) * 8
    rows = max(rows, 8)
    return min(rows, n_rows)


@jax.jit
def channel_wise_multiply(x, param):
    """x: (N, C, H, W), param: (C,) -> x * param[None, :, None, None]."""
    N, C, H, W = x.shape
    R, L = N * C, H * W

    # Free row-major reshape to a lane-dense 2D slab.
    x2 = x.reshape(R, L)
    # Pre-broadcast the per-channel scale to one scalar per row (N*C, 1);
    # the extra R*4 bytes of traffic is noise next to x itself.
    p2 = jnp.broadcast_to(param[None, :], (N, C)).reshape(R, 1).astype(x.dtype)

    rows_blk = _pick_rows_block(R, L, jnp.dtype(x.dtype).itemsize)
    grid = (pl.cdiv(R, rows_blk),)

    out2 = pl.pallas_call(
        _scale_rows_kernel,
        out_shape=jax.ShapeDtypeStruct((R, L), x.dtype),
        grid=grid,
        in_specs=[
            pl.BlockSpec((rows_blk, L), lambda i: (i, 0)),  # x tile
            pl.BlockSpec((rows_blk, 1), lambda i: (i, 0)),  # per-row scale
        ],
        out_specs=pl.BlockSpec((rows_blk, L), lambda i: (i, 0)),
        compiler_params=pltpu.CompilerParams(
            dimension_semantics=("parallel",),
            vmem_limit_bytes=64 * 1024 * 1024,
        ),
    )(x2, p2)

    return out2.reshape(N, C, H, W)


if __name__ == "__main__":
    key = jax.random.PRNGKey(0)
    kx, kp = jax.random.split(key)

    N, C, H, W = 2, 4, 16, 16
    x = jax.random.normal(kx, (N, C, H, W), dtype=jnp.float32)
    param = jax.random.normal(kp, (C,), dtype=jnp.float32)

    out = channel_wise_multiply(x, param)
    out = jax.block_until_ready(out)

    ref = param.reshape(1, C, 1, 1) * x
    assert out.shape == x.shape and out.dtype == x.dtype
    assert jnp.allclose(out, ref, atol=1e-6, rtol=1e-6)
    print("KERNEL_OK")
</pallas_src>

<mosaic_0001>
module attributes {stable_mosaic.version = 11 : i64} {
  func.func @_scale_rows_kernel(%arg0: i32, %arg1: memref<8x256xf32, #tpu.memory_space<vmem>>, %arg2: memref<8x1xf32, #tpu.memory_space<vmem>>, %arg3: memref<8x256xf32, #tpu.memory_space<vmem>>) attributes {dimension_semantics = [#tpu.dimension_semantics<parallel>], iteration_bounds = array<i64: 1>, scalar_prefetch = 0 : i64, scratch_operands = 0 : i64, tpu.core_type = #tpu.core_type<tc>, window_params = [{transform_indices = @transform_0, window_bounds = array<i64: 8, 256>}, {transform_indices = @transform_1, window_bounds = array<i64: 8, 1>}, {transform_indices = @transform_2, window_bounds = array<i64: 8, 256>}]} {
    %c0 = arith.constant 0 : index
    %c0_0 = arith.constant 0 : index
    %0 = vector.load %arg1[%c0, %c0_0] : memref<8x256xf32, #tpu.memory_space<vmem>>, vector<8x256xf32>
    %c0_1 = arith.constant 0 : index
    %c0_2 = arith.constant 0 : index
    %1 = vector.load %arg2[%c0_1, %c0_2] : memref<8x1xf32, #tpu.memory_space<vmem>>, vector<8x1xf32>
    %2 = vector.broadcast %1 : vector<8x1xf32> to vector<8x256xf32>
    %3 = arith.mulf %0, %2 : vector<8x256xf32>
    %c0_3 = arith.constant 0 : index
    %c0_4 = arith.constant 0 : index
    %4 = vector.load %arg3[%c0_3, %c0_4] : memref<8x256xf32, #tpu.memory_space<vmem>>, vector<8x256xf32>
    tpu.vector_store %arg3[%c0_3, %c0_4], %3 {strides = array<i32>} : memref<8x256xf32, #tpu.memory_space<vmem>>, vector<8x256xf32>,
    return
  }
  func.func @transform_0(%arg0: i32) -> (i32, i32) {
    %c0_i32 = arith.constant 0 : i32
    %c0_i32_0 = arith.constant 0 : i32
    return %arg0, %c0_i32 : i32, i32
  }
  func.func @transform_1(%arg0: i32) -> (i32, i32) {
    %c0_i32 = arith.constant 0 : i32
    %c0_i32_0 = arith.constant 0 : i32
    return %arg0, %c0_i32 : i32, i32
  }
  func.func @transform_2(%arg0: i32) -> (i32, i32) {
    %c0_i32 = arith.constant 0 : i32
    %c0_i32_0 = arith.constant 0 : i32
    return %arg0, %c0_i32 : i32, i32
  }
}

</mosaic_0001>

<bundles_post_ra>
// kernel: channel_wise_multiply.1
= control target key start
LH: loop header
LB: loop body
LE: loop exit
PB: predicated region body
PF: predicated region fallthrough
CT: control target
= control target key end

     0   :  { %7 = vsyncpa [#allocation3], 0  ;;  %s196_s0 = inlined_call_operand.hbm [shape: f32[8,256], index: 0, kind: input, shape index: {}]   ;;  %s197_s1 = inlined_call_operand.hbm [shape: f32[8,1], index: 1, kind: input, shape index: {}]   ;;  %s198_s2 = inlined_call_operand.hbm [shape: f32[8,256], index: 2, kind: output, shape index: {}]  }
   0x1   :  { %8 = vsyncpa [#allocation6], 0 }
   0x2   :  { %9 = vsyncpa [#allocation4], 0  ;;  %s141_s9 = smov [#allocation2]   ;;  %s142_s11 = smov [#allocation5]  }
   0x3   :  { %s16_s10 = sshll.u32 %s141_s9, 4  ;;  %s26_s12 = sshll.u32 %s142_s11, 4  ;;  %s17_s10 = int_to_ptr.vmem [resolvable:$true] %s16_s10  ;;  %s27_s12 = int_to_ptr.vmem [resolvable:$true] %s26_s12 }
   0x4   :  { %s69_s15 = scalar_lea.hbm %s196_s0, 256 }
   0x5   :  { %p70_p0 = scmp.ne.s32.totalorder %s196_s0, %s69_s15  ;;  %p73_p1 = scmp.lt.u32.totalorder %s69_s15, %s196_s0 }
   0x7   :  { %p75_p2 = pnand %p73_p1, %p70_p0 }
   0x9   :  { %78 = shalt.err (!%p75_p2)
}
   0xa   :  { %s79_s20 = scalar_lea.vmem %s17_s10, 256  ;;  %p84_p4 = scmp.lt.s32.totalorder %s17_s10, %s17_s10 }
   0xb   :  { %p80_p3 = scmp.ne.s32.totalorder %s17_s10, %s79_s20  ;;  %p85_p5 = scmp.lt.s32.totalorder %s79_s20, %s79_s20 }
   0xd   :  { %p86_p6 = por %p85_p5, %p84_p4 }
   0xf   :  { %p87_p7 = pnand %p86_p6, %p80_p3 }
  0x11   :  { %90 = shalt.err (!%p87_p7)
}
  0x12   :  { %19 = dma.hbm_to_vmem [thread:$0]  %s196_s0, 256, %s17_s10, [#allocation3]  }
  0x13   :  { %s91_s25 = scalar_lea.hbm %s197_s1, 128 }
  0x14   :  { %p92_p8 = scmp.ne.s32.totalorder %s197_s1, %s91_s25  ;;  %p95_p9 = scmp.lt.u32.totalorder %s91_s25, %s197_s1 }
  0x16   :  { %p97_p10 = pnand %p95_p9, %p92_p8 }
  0x18   :  { %100 = shalt.err (!%p97_p10)
}
  0x19   :  { %s101_s30 = scalar_lea.vmem %s27_s12, 128  ;;  %p106_p12 = scmp.lt.s32.totalorder %s27_s12, %s27_s12 }
  0x1a   :  { %p102_p11 = scmp.ne.s32.totalorder %s27_s12, %s101_s30  ;;  %p107_p13 = scmp.lt.s32.totalorder %s101_s30, %s101_s30 }
  0x1c   :  { %p108_p0 = por %p107_p13, %p106_p12 }
  0x1e   :  { %p109_p1 = pnand %p108_p0, %p102_p11 }
  0x20   :  { %112 = shalt.err (!%p109_p1)
}
  0x21   :  { %29 = dma.hbm_to_vmem [thread:$0]  %s197_s1, 128, %s27_s12, [#allocation6]  }
  0x22   :  { %135 = dma.done.wait [#allocation3], 256  }
  0x23   :  { %136 = vsyncadd [#allocation3], 4294967040 }
  0x24   :  { %137 = dma.done.wait [#allocation6], 128  }
  0x25   :  { %138 = vsyncadd [#allocation6], 4294967168  ;;  %v143_v0 = vmov 0   ;;  %v38_v1 = vld [vmem:[#allocation5] sm:$0xff]  ;;  %v36_v2 = vld [vmem:[#allocation2] sm:$0xff]  ;;  %s144_s4 = smov [#allocation7]  }
  0x26   :  { %68 = vset.pattern.permute.xlu0 %v143_v0  ;;  %v37_v3 = vld [vmem:[#allocation2 + $0x8] sm:$0xff]  ;;  %s54_s5 = sshll.u32 %s144_s4, 4  ;;  %s55_s5 = int_to_ptr.vmem [resolvable:$true] %s54_s5 }
  0x27   :  { %41 = vperm.xlu0 %68, %v38_v1   ;;  %s113_s6 = scalar_lea.vmem %s55_s5, 256  ;;  %p118_p3 = scmp.lt.s32.totalorder %s55_s5, %s55_s5 }
  0x28   :  { %p114_p2 = scmp.ne.s32.totalorder %s55_s5, %s113_s6  ;;  %p119_p4 = scmp.lt.s32.totalorder %s113_s6, %s113_s6 }
  0x2a   :  { %p120_p5 = por %p119_p4, %p118_p3 }
  0x2c   :  { %p121_p6 = pnand %p120_p5, %p114_p2 }
  0xa6   :  { %v42_v4 = vpop.permute.xlu0 %41 }
  0xa7   :  { %v44_v5 = vmul.f32 %v42_v4, %v36_v2  ;;  %v45_v6 = vmul.f32 %v42_v4, %v37_v3 }
  0xa9   :  { %46 = vst [vmem:[#allocation7] sm:$0xff] %v44_v5  ;;  %47 = vst [vmem:[#allocation7 + $0x8] sm:$0xff] %v45_v6 }
  0xaa   :  { %124 = shalt.err (!%p121_p6)
}
  0xab   :  { %s125_s8 = scalar_lea.hbm %s198_s2, 256 }
  0xac   :  { %p126_p7 = scmp.ne.s32.totalorder %s198_s2, %s125_s8  ;;  %p129_p8 = scmp.lt.u32.totalorder %s125_s8, %s198_s2 }
  0xae   :  { %p131_p9 = pnand %p129_p8, %p126_p7 }
  0xb0   :  { %134 = shalt.err (!%p131_p9)
}
  0xb1   :  { %57 = dma.vmem_to_hbm [thread:$0]  %s55_s5, 256, %s198_s2, [#allocation4]  }
  0xb2   :  { %139 = dma.done.wait [#allocation4], 256  }
  0xb3   :  { %140 = vsyncadd [#allocation4], 4294967040 }
  0xb4   :  { %61 = vsyncpa [#allocation3], 1 }
  0xb5   :  { %62 = vsyncpa [#allocation6], 1 }
  0xb6   :  { %63 = vsyncpa [#allocation4], 1 }

</bundles_post_ra>
